<compile_context>
chip_gen: v7x
topology: tpu7x:2x2x1
jax: 0.10.0
libtpu: 0.0.40
codegen_flags: <defaults>
</compile_context>

<pallas_src>
import jax
import jax.numpy as jnp
from jax.experimental import pallas as pl
from jax.experimental.pallas import tpu as pltpu


def _round_up(v, m):
    return (v + m - 1) // m * m


def _largest_aligned_divisor(total, align, upper):
    """Largest d with d | total, d % align == 0 and d <= upper (total % align == 0)."""
    nblocks = max(total // align, 1)
    for nb in range(1, nblocks + 1):
        if nblocks % nb == 0 and total // nb <= upper:
            return total // nb
    return align


def _vmem_capacity_bytes():
    try:
        info = pltpu.get_tpu_info()
        cap = int(getattr(info, "vmem_capacity_bytes", 128 * 2 ** 20))
        if cap <= 0:
            cap = 128 * 2 ** 20
        return cap
    except Exception:
        return 128 * 2 ** 20


def _choose_tiles(M, Np, Kp, in_bytes, out_bytes):
    """Pick (tm, tn, tk, vmem_limit_bytes) for the padded problem (Mp? x Kp) @ (Kp x Np)."""
    cap = _vmem_capacity_bytes()
    budget = min(cap - 16 * 2 ** 20, 96 * 2 ** 20)          # working-set budget (v7x aware)

    sub = {1: 32, 2: 16, 4: 8}.get(in_bytes, 8)              # sublane packing per dtype
    if M >= 1024:
        tm_t, tn_t = 512, 1024                               # prefill / training shapes
    else:
        tm_t, tn_t = 256, 512
    tm = min(tm_t, _round_up(M, sub))
    tn = _largest_aligned_divisor(Np, 128, tn_t)

    # v7x megacore: with a single M tile keep >= 2 blocks on the N (parallel) axis.
    if _round_up(M, tm) // tm == 1 and Np // tn < 2:
        tn2 = _largest_aligned_divisor(Np, 128, max(128, tn // 2))
        if Np // tn2 >= 2:
            tn = tn2

    def est(tk, with_acc):
        e = (2 * (tm * tk + tk * tn) * in_bytes              # double-buffered x / w tiles
             + 2 * tm * tn * out_bytes                       # double-buffered output tile
             + 2 * tn * 4)                                   # bias tile
        if with_acc:
            e += tm * tn * 4                                 # f32 accumulator scratch
        return e

    if est(Kp, False) <= budget:
        tk = Kp                                              # whole K in one block (common case)
    else:
        avail = budget - 2 * tm * tn * out_bytes - tm * tn * 4 - 2 * tn * 4
        tk_max = max(avail // (2 * (tm + tn) * in_bytes), 128)
        tk = _largest_aligned_divisor(Kp, 128, tk_max)

    vmem_limit = int(min(cap - 8 * 2 ** 20,
                         max(32 * 2 ** 20, est(tk, Kp // tk > 1) + 8 * 2 ** 20)))
    return tm, tn, tk, vmem_limit


# ---------------- kernels ----------------
# Single-K-block variants: direct write, no accumulator scratch.

def _mm_bias_kernel(x_ref, w_ref, b_ref, o_ref):
    o_ref[...] = (jnp.dot(x_ref[...], w_ref[...], preferred_element_type=jnp.float32)
                  + b_ref[...]).astype(o_ref.dtype)


def _mm_kernel(x_ref, w_ref, o_ref):
    o_ref[...] = jnp.dot(x_ref[...], w_ref[...],
                         preferred_element_type=jnp.float32).astype(o_ref.dtype)


# K-split variants: f32 accumulator, initialized with the first partial product.

def _mm_bias_acc_kernel(x_ref, w_ref, b_ref, o_ref, acc_ref):
    k = pl.program_id(2)
    part = jnp.dot(x_ref[...], w_ref[...], preferred_element_type=jnp.float32)

    @pl.when(k == 0)
    def _():
        acc_ref[...] = part

    @pl.when(k > 0)
    def _():
        acc_ref[...] += part

    @pl.when(k == pl.num_programs(2) - 1)
    def _():
        o_ref[...] = (acc_ref[...] + b_ref[...]).astype(o_ref.dtype)


def _mm_acc_kernel(x_ref, w_ref, o_ref, acc_ref):
    k = pl.program_id(2)
    part = jnp.dot(x_ref[...], w_ref[...], preferred_element_type=jnp.float32)

    @pl.when(k == 0)
    def _():
        acc_ref[...] = part

    @pl.when(k > 0)
    def _():
        acc_ref[...] += part

    @pl.when(k == pl.num_programs(2) - 1)
    def _():
        o_ref[...] = acc_ref[...].astype(o_ref.dtype)


# ---------------- one-time weight preparation (== merge_lora_weights) ----------------

def merge_and_prepare_weights(weight, lora_A=None, lora_B=None, bias=None, *, scale=1.0):
    """Merge LoRA into the weight ONCE, transpose to [K, N] and pad to (128,128).

    weight: [out_features, in_features]
    lora_A: [rank, in_features] (already sliced for this tp rank) or None
    lora_B: [out_features, rank] or None
    scale : explicit LoRA scale (alpha/rank) applied during the merge.
    """
    N, K = weight.shape
    if lora_A is not None and lora_B is not None:
        w_eff = weight.astype(jnp.float32) + scale * (
            lora_B.astype(jnp.float32) @ lora_A.astype(jnp.float32))
        w_eff = w_eff.astype(weight.dtype)
    else:
        w_eff = weight
    w_t = w_eff.T                                            # [K, N] lane-dense output layout
    Kp = _round_up(K, 128)
    Np = _round_up(N, 128)
    if (Kp, Np) != (K, N):
        w_t = jnp.pad(w_t, ((0, Kp - K), (0, Np - N)))
    bias2d = None
    if bias is not None:
        bias2d = jnp.pad(bias.astype(jnp.float32), (0, Np - N)).reshape(1, Np)
    return {"w_t": w_t, "bias2d": bias2d, "bias_vec": bias,
            "in_features": K, "out_features": N}


# ---------------- forward ----------------

def row_parallel_linear_with_lora(x, prepared, *, skip_bias_add=False, _tk_cap=None):
    """Forward of RowParallelLinearWithLoRA with merged LoRA weights.

    x:        [..., in_features]
    prepared: result of merge_and_prepare_weights (one-time).
    Returns (output [..., out_features], output_bias).
    """
    w_t = prepared["w_t"]
    Kp, Np = w_t.shape
    K = prepared["in_features"]
    N = prepared["out_features"]

    *lead, Kx = x.shape
    assert Kx == K, "in_features mismatch"
    x2d = x.reshape(-1, K)
    M = x2d.shape[0]

    in_bytes = jnp.dtype(x.dtype).itemsize
    out_bytes = in_bytes
    tm, tn, tk, vmem_limit = _choose_tiles(M, Np, Kp, in_bytes, out_bytes)
    if _tk_cap is not None:                                  # test/debug knob: force K split
        tk = _largest_aligned_divisor(Kp, 128, min(tk, _tk_cap))

    Mp = _round_up(M, tm)
    if (Mp, Kp) != (M, K):                                   # pad activations only (cheap)
        x2d = jnp.pad(x2d, ((0, Mp - M), (0, Kp - K)))

    use_bias = (prepared["bias2d"] is not None) and (not skip_bias_add)
    Nt, Mt, Kt = Np // tn, Mp // tm, Kp // tk

    if Kt == 1:
        grid = (Nt, Mt)
        x_spec = pl.BlockSpec((tm, tk), lambda j, i: (i, 0))
        w_spec = pl.BlockSpec((tk, tn), lambda j, i: (0, j))
        b_spec = pl.BlockSpec((1, tn), lambda j, i: (0, j))
        o_spec = pl.BlockSpec((tm, tn), lambda j, i: (i, j))
        semantics = ("parallel", "parallel")
        scratch = []
        kernel = _mm_bias_kernel if use_bias else _mm_kernel
    else:
        grid = (Nt, Mt, Kt)
        x_spec = pl.BlockSpec((tm, tk), lambda j, i, k: (i, k))
        w_spec = pl.BlockSpec((tk, tn), lambda j, i, k: (k, j))
        b_spec = pl.BlockSpec((1, tn), lambda j, i, k: (0, j))
        o_spec = pl.BlockSpec((tm, tn), lambda j, i, k: (i, j))
        semantics = ("parallel", "parallel", "arbitrary")
        scratch = [pltpu.VMEM((tm, tn), jnp.float32)]
        kernel = _mm_bias_acc_kernel if use_bias else _mm_acc_kernel

    in_specs = [x_spec, w_spec] + ([b_spec] if use_bias else [])
    operands = [x2d, w_t] + ([prepared["bias2d"]] if use_bias else [])

    out = pl.pallas_call(
        kernel,
        out_shape=jax.ShapeDtypeStruct((Mp, Np), x.dtype),
        grid_spec=pltpu.PrefetchScalarGridSpec(
            num_scalar_prefetch=0,
            grid=grid,
            in_specs=in_specs,
            out_specs=o_spec,
            scratch_shapes=scratch,
        ),
        compiler_params=pltpu.CompilerParams(
            dimension_semantics=semantics,
            vmem_limit_bytes=vmem_limit,
        ),
    )(*operands)

    output = out[:M, :N].reshape(*lead, N)
    output_bias = prepared["bias_vec"] if skip_bias_add else None
    return output, output_bias


if __name__ == "__main__":
    key = jax.random.PRNGKey(0)
    k_x, k_w, k_a, k_b, k_bias = jax.random.split(key, 5)

    # ---- Case 1: f32, ragged shapes (padding path), bias, K in one block ----
    batch, seq, in_f, out_f, rank = 2, 9, 200, 384, 8
    x = jax.random.normal(k_x, (batch, seq, in_f), dtype=jnp.float32)
    weight = jax.random.normal(k_w, (out_f, in_f), dtype=jnp.float32) * 0.02
    lora_A = jax.random.normal(k_a, (rank, in_f), dtype=jnp.float32) * 0.1
    lora_B = jax.random.normal(k_b, (out_f, rank), dtype=jnp.float32) * 0.1
    bias = jax.random.normal(k_bias, (out_f,), dtype=jnp.float32) * 0.1

    prepared = merge_and_prepare_weights(weight, lora_A, lora_B, bias)
    out, out_bias = row_parallel_linear_with_lora(x, prepared)
    out = jax.block_until_ready(out)

    w_merged = weight + lora_B @ lora_A
    ref = jnp.einsum("bsk,nk->bsn", x, w_merged) + bias
    assert out.shape == (batch, seq, out_f)
    assert out_bias is None
    assert jnp.allclose(out, ref, atol=1e-3, rtol=1e-3)

    # skip_bias_add path (no-bias kernel; bias returned separately)
    out_sb, out_bias_sb = row_parallel_linear_with_lora(x, prepared, skip_bias_add=True)
    out_sb = jax.block_until_ready(out_sb)
    ref_sb = jnp.einsum("bsk,nk->bsn", x, w_merged)
    assert out_bias_sb is not None and out_bias_sb.shape == (out_f,)
    assert jnp.allclose(out_sb, ref_sb, atol=1e-3, rtol=1e-3)

    # ---- Case 2: bf16 operands, forced K split (accumulator kernel path) ----
    xb = jax.random.normal(k_x, (2, 8, 256), dtype=jnp.float32).astype(jnp.bfloat16)
    wb = (jax.random.normal(k_w, (512, 256), dtype=jnp.float32) * 0.02).astype(jnp.bfloat16)
    ab = (jax.random.normal(k_a, (8, 256), dtype=jnp.float32) * 0.1).astype(jnp.bfloat16)
    bb = (jax.random.normal(k_b, (512, 8), dtype=jnp.float32) * 0.1).astype(jnp.bfloat16)
    biasb = jax.random.normal(k_bias, (512,), dtype=jnp.float32) * 0.1

    preparedb = merge_and_prepare_weights(wb, ab, bb, biasb)
    outb, _ = row_parallel_linear_with_lora(xb, preparedb, _tk_cap=128)
    outb = jax.block_until_ready(outb)

    wmb = (wb.astype(jnp.float32) + bb.astype(jnp.float32) @ ab.astype(jnp.float32)
           ).astype(jnp.bfloat16)
    refb = (jnp.einsum("bsk,nk->bsn", xb, wmb, preferred_element_type=jnp.float32)
            + biasb).astype(jnp.bfloat16)
    assert outb.dtype == jnp.bfloat16
    assert jnp.allclose(outb.astype(jnp.float32), refb.astype(jnp.float32),
                        atol=3e-2, rtol=3e-2)

    # ---- Case 3: no bias at all (no-bias single-K-block kernel) ----
    preparedn = merge_and_prepare_weights(wb, ab, bb, None)
    outn, outn_bias = row_parallel_linear_with_lora(xb, preparedn)
    outn = jax.block_until_ready(outn)
    refn = jnp.einsum("bsk,nk->bsn", xb, wmb,
                      preferred_element_type=jnp.float32).astype(jnp.bfloat16)
    assert outn_bias is None
    assert jnp.allclose(outn.astype(jnp.float32), refn.astype(jnp.float32),
                        atol=3e-2, rtol=3e-2)

    print("KERNEL_OK")
</pallas_src>

<mosaic_0001>
module attributes {stable_mosaic.version = 11 : i64} {
  func.func @_mm_bias_kernel(%arg0: i32, %arg1: i32, %arg2: memref<24x256xf32, #tpu.memory_space<vmem>>, %arg3: memref<256x128xf32, #tpu.memory_space<vmem>>, %arg4: memref<1x128xf32, #tpu.memory_space<vmem>>, %arg5: memref<24x128xf32, #tpu.memory_space<vmem>>) attributes {dimension_semantics = [#tpu.dimension_semantics<parallel>, #tpu.dimension_semantics<parallel>], iteration_bounds = array<i64: 3, 1>, scalar_prefetch = 0 : i64, scratch_operands = 0 : i64, tpu.core_type = #tpu.core_type<tc>, window_params = [{transform_indices = @transform_0, window_bounds = array<i64: 24, 256>}, {transform_indices = @transform_1, window_bounds = array<i64: 256, 128>}, {transform_indices = @transform_2, window_bounds = array<i64: 1, 128>}, {transform_indices = @transform_3, window_bounds = array<i64: 24, 128>}]} {
    %c0 = arith.constant 0 : index
    %c0_0 = arith.constant 0 : index
    %0 = vector.load %arg2[%c0, %c0_0] : memref<24x256xf32, #tpu.memory_space<vmem>>, vector<24x256xf32>
    %c0_1 = arith.constant 0 : index
    %c0_2 = arith.constant 0 : index
    %1 = vector.load %arg3[%c0_1, %c0_2] : memref<256x128xf32, #tpu.memory_space<vmem>>, vector<256x128xf32>
    %cst = arith.constant dense<0.000000e+00> : vector<24x128xf32>
    %2 = tpu.matmul %0, %1, %cst {dimension_numbers = #tpu.dot_dimension_numbers<[1], [0], [0], [1], [0, 0, 1, 1], [], []>} : vector<24x256xf32>, vector<256x128xf32>, vector<24x128xf32> -> vector<24x128xf32>
    %c0_3 = arith.constant 0 : index
    %c0_4 = arith.constant 0 : index
    %3 = vector.load %arg4[%c0_3, %c0_4] : memref<1x128xf32, #tpu.memory_space<vmem>>, vector<1x128xf32>
    %4 = vector.broadcast %3 : vector<1x128xf32> to vector<24x128xf32>
    %5 = arith.addf %2, %4 : vector<24x128xf32>
    %c0_5 = arith.constant 0 : index
    %c0_6 = arith.constant 0 : index
    %6 = vector.load %arg5[%c0_5, %c0_6] : memref<24x128xf32, #tpu.memory_space<vmem>>, vector<24x128xf32>
    tpu.vector_store %arg5[%c0_5, %c0_6], %5 {strides = array<i32>} : memref<24x128xf32, #tpu.memory_space<vmem>>, vector<24x128xf32>,
    return
  }
  func.func @transform_0(%arg0: i32, %arg1: i32) -> (i32, i32) {
    %c0_i32 = arith.constant 0 : i32
    %c0_i32_0 = arith.constant 0 : i32
    return %arg1, %c0_i32 : i32, i32
  }
  func.func @transform_1(%arg0: i32, %arg1: i32) -> (i32, i32) {
    %c0_i32 = arith.constant 0 : i32
    %c0_i32_0 = arith.constant 0 : i32
    return %c0_i32, %arg0 : i32, i32
  }
  func.func @transform_2(%arg0: i32, %arg1: i32) -> (i32, i32) {
    %c0_i32 = arith.constant 0 : i32
    %c0_i32_0 = arith.constant 0 : i32
    return %c0_i32, %arg0 : i32, i32
  }
  func.func @transform_3(%arg0: i32, %arg1: i32) -> (i32, i32) {
    %c0_i32 = arith.constant 0 : i32
    return %arg1, %arg0 : i32, i32
  }
}

</mosaic_0001>

<bundles_post_ra>
// kernel: tpu_custom_call.1
= control target key start
LH: loop header
LB: loop body
LE: loop exit
PB: predicated region body
PF: predicated region fallthrough
CT: control target
= control target key end

     0   :  { %8 = vsyncpa [#allocation3], 0  ;;  %s1105_s0 = inlined_call_operand.hbm [shape: f32[24,256], index: 0, kind: input, shape index: {}]   ;;  %s1106_s1 = inlined_call_operand.hbm [shape: f32[256,384], index: 1, kind: input, shape index: {}]   ;;  %s1107_s2 = inlined_call_operand.vmem [shape: f32[1,384], index: 2, kind: input, shape index: {}]   ;;  %s1108_s3 = inlined_call_operand.hbm [shape: f32[24,384], index: 3, kind: output, shape index: {}]  }
   0x1   :  { %9 = vsyncpa [#allocation6], 0 }
   0x2   :  { %11 = vsyncpa [#allocation6 + $0x1], 0 }
   0x3   :  { %12 = vsyncpa [#allocation4], 0 }
   0x4   :  { %14 = vsyncpa [#allocation4 + $0x1], 0  ;;  %s854_s12 = smov 0   ;;  %s856_s13 = smov 0  }
   0x5   :  { %s858_s14 = smov 0   ;;  %s860_s15 = smov 0  }
   0x6   :  { %s862_s16 = smov 0   ;;  %s864_s17 = smov 0  }
   0x7 LB: > { %s492_s18 = sadd.s32 4294967295, %s821_s17   ;;  %s493_s19 = sadd.s32 4294967294, %s821_s17   ;;  %s821_s17 = sphi %s864_s17, %s20_s17   ;;  %s817_s16 = sphi %s862_s16, %s1133_s16   ;;  %s813_s15 = sphi %s860_s15, %s1132_s15   ;;  %s809_s14 = sphi %s858_s14, %s1131_s14   ;;  %s805_s13 = sphi %s856_s13, %s1130_s13   ;;  %s801_s12 = sphi %s854_s12, %s1129_s12  }
   0x8   : > { %p72_p0 = scmp.ne.s32.totalorder %s809_s14, %s805_s13  ;;  %p73_p1 = scmp.eq.s32.totalorder %s821_s17, 0 }
   0x9   : > { %p78_p2 = scmp.ne.s32.totalorder %s805_s13, %s801_s12  ;;  %p891_p3 = scmp.eq.s32.totalorder %s492_s18, 0 }
   0xa   : > { %p895_p4 = por %p73_p1, %p72_p0  ;;  %p130_p5 = scmp.eq.s32.totalorder %s492_s18, 2 }
   0xb   : > { %s1115_s20 = scalar_select %p891_p3, 1, 0 }
   0xc   : > { %p901_p6 = por %p891_p3, %p78_p2  ;;  %p136_p7 = scmp.eq.s32.totalorder %s493_s19, 2 }
   0xd   : > { %p905_p8 = por %p130_p5, %p72_p0  ;;  %p494_p9 = scmp.ge.s32.totalorder %s821_s17, 1 }
   0xe   : > { %s1117_s22 = scalar_select %p901_p6, 1, 0 }
   0xf   : > { %s1118_s23 = scalar_select %p905_p8, 1, 0 }
  0x10   : > { %p910_p10 = por %p136_p7, %p78_p2  ;;  %p143_p11 = scmp.lt.s32.totalorder %s821_s17, 4 }
  0x11   : > { %s823_s26 = smov [#allocation2]   ;;  %p617_p0 = scmp.lt.s32.totalorder %s821_s17, 3 }
  0x12   : > { %s1119_s24 = scalar_select %p910_p10, 1, 0 }
  0x13   : > { %p915_p12 = pnand %p494_p9, %p143_p11  ;;  %s159_s27 = sshll.u32 %s823_s26, 4  ;;  %s160_s27 = int_to_ptr.vmem [resolvable:$true] %s159_s27 }
  0x14   : > { %p930_p2 = pnand %p617_p0, %p895_p4  ;;  %s32_s30 = sadd.s32 1, %s817_s16 }
  0x15   : > { %s1120_s25 = scalar_select %p915_p12, 1, 0 }
  0x16   : > { %p604_p13 = pneg %p915_p12  ;;  %s677_s6 = scalar_lea.hbm %s1105_s0, 768 }
  0x17   : > { %s1122_s29 = scalar_select %p930_p2, 1, 0 }
  0x18   : > { %p924_p1 = pnand %p604_p13, %p891_p3  ;;  %p678_p5 = scmp.ne.s32.totalorder %s1105_s0, %s677_s6 }
  0x19   : > { %p684_p4 = scmp.lt.u32.totalorder %s677_s6, %s1105_s0 }
  0x1a   : > { %p679_p7 = pneg %p924_p1 }
  0x1c   : > { %p680_p9 = pnand %p679_p7, %p678_p5 }
  0x1e   : > { %p681_p11 = pneg %p680_p9 }
  0x20   : > { %p686_p13 = pnand %p684_p4, %p681_p11 }
  0x22   : > { %689 = shalt.err (!%p686_p13)
}
  0x23   : > { %s690_s11 = scalar_lea.vmem %s160_s27, 768  ;;  %p698_p6 = scmp.lt.s32.totalorder %s160_s27, %s160_s27 }
  0x24   : > { %p691_p0 = scmp.ne.s32.totalorder %s160_s27, %s690_s11  ;;  %p699_p3 = scmp.lt.s32.totalorder %s690_s11, %s690_s11 }
  0x26   : > { %p693_p10 = pnand %p691_p0, %p679_p7  ;;  %p700_p12 = por %p699_p3, %p698_p6 }
  0x28   : > { %p694_p8 = pneg %p693_p10 }
  0x2a   : > { %p701_p2 = pnand %p700_p12, %p694_p8 }
  0x2c   : > { %704 = shalt.err (!%p701_p2)
}
  0x2d   : > { %s824_s18 = smov 256   ;;  %s825_s19 = smov 16  }
  0x2e   : > { %607 = dma.hbm_to_vmem [thread:$0]  (!%p924_p1), %s1105_s0, 768, %s160_s27, [#allocation3], %s824_s18, %s824_s18, %s825_s19  }
  0x2f   : > { %p34_p5 = scmp.ge.s32.totalorder %s32_s30, 3  ;;  %s65_s4 = sadd.s32 1, %s809_s14 }
  0x30   : > { %s173_s5 = sand.u32 1, %s809_s14   ;;  %s498_s8 = sshll.u32 %s817_s16, 7 }
  0x31   : > { %s1135_s30 = smov (%p34_p5, %s32_s30), 0  ;;  %s497_s6 = sshll.u32 %s173_s5, 8 }
  0x32   : > { %s62_s7 = ssub.s32 %s817_s16, %s1135_s30  ;;  %s961_s28 = scalar_lea.hbm %s1106_s1, %s498_s8 }
  0x33   : > { %p63_p3 = scmp.eq.s32.totalorder %s62_s7, 0  ;;  %s177_s27 = scalar_lea.vmem [#allocation5], %s497_s6 }
  0x34   : > { %s183_s11 = sshll.u32 %s177_s27, 4  ;;  %s968_s19 = scalar_lea.sflag [#allocation6], %s173_s5  ;;  %s966_s11 = int_to_ptr.vmem [resolvable:$true] %s183_s11 }
  0x35   : > { %s964_s18 = scalar_select %p63_p3, %s809_s14, %s65_s4  }
  0x36   : > { %s705_s21 = scalar_lea.hbm %s961_s28, 4096  ;;  %p1123_p8 = scmp.ne.s32.totalorder %s1122_s29, 0 }
  0x37   : > { %p706_p6 = scmp.ne.s32.totalorder %s961_s28, %s705_s21  ;;  %s710_s8 = scalar_lea.hbm %s1106_s1, 12288 }
  0x38   : > { %p707_p10 = pneg %p1123_p8  ;;  %p711_p2 = scmp.lt.u32.totalorder %s961_s28, %s1106_s1 }
  0x39   : > { %p712_p7 = scmp.lt.u32.totalorder %s710_s8, %s705_s21  ;;  %p714_p11 = scmp.lt.u32.totalorder %s705_s21, %s961_s28 }
  0x3a   : > { %p708_p12 = pnand %p707_p10, %p706_p6 }
  0x3b   : > { %p713_p9 = por %p712_p7, %p711_p2 }
  0x3c   : > { %p709_p1 = pneg %p708_p12 }
  0x3d   : > { %p715_p4 = por %p714_p11, %p713_p9 }
  0x3f   : > { %p716_p13 = pnand %p715_p4, %p709_p1 }
  0x41   : > { %719 = shalt.err (!%p716_p13)
}
  0x42   : > { %s720_s4 = scalar_lea.vmem %s966_s11, 4096  ;;  %s826_s5 = smov [#allocation5]  }
  0x43   : > { %p721_p0 = scmp.ne.s32.totalorder %s966_s11, %s720_s4  ;;  %s725_s10 = sshll.u32 %s826_s5, 4  ;;  %s726_s10 = int_to_ptr.vmem [resolvable:$false] %s725_s10 }
  0x44   : > { %s727_s27 = scalar_lea.vmem %s726_s10, 8192  ;;  %p728_p6 = scmp.lt.s32.totalorder %s966_s11, %s726_s10 }
  0x45   : > { %p723_p5 = pnand %p721_p0, %p707_p10  ;;  %p729_p12 = scmp.lt.s32.totalorder %s727_s27, %s720_s4 }
  0x47   : > { %p724_p3 = pneg %p723_p5  ;;  %p730_p2 = por %p729_p12, %p728_p6 }
  0x49   : > { %p731_p7 = pnand %p730_p2, %p724_p3 }
  0x4b   : > { %734 = shalt.err (!%p731_p7)
}
  0x4c   : > { %s827_s21 = smov 384   ;;  %s828_s26 = smov 128  }
  0x4d   : > { %s829_s7 = smov 8   ;;  %p1124_p10 = scmp.ne.s32.totalorder %s1120_s25, 0 }
  0x4e   : > { %611 = dma.hbm_to_vmem [thread:$0]  (!%p1123_p8), %s961_s28, 4096, %s966_s11, %s968_s19, %s827_s21, %s828_s26, %s829_s7  }
  0x4f   : > { %201 = sbr.rel (%p1124_p10) target bundleno = 363 (0x16b), region = 32  ;;  %p1125_p1 = scmp.ne.s32.totalorder (!%p1124_p10), %s1115_s20, 0 }
  0x56   : > { %788 = dma.done.wait (%p1125_p1), [#allocation3], 768  }
  0x57   : > { %790 = vsyncadd (%p1125_p1), [#allocation3], 4294966528  ;;  %s1003_s8 = sand.u32 1, %s805_s13   ;;  %p1126_p8 = scmp.ne.s32.totalorder %s1117_s22, 0 }
  0x58   : > { %s501_s6 = sshll.u32 %s1003_s8, 8  ;;  %s208_s9 = scalar_lea.sflag [#allocation6], %s1003_s8 }
  0x59   : > { %s1007_s4 = scalar_lea.vmem [#allocation5], %s501_s6 }
  0x5a   : > { %792 = dma.done.wait (%p1126_p8), %s208_s9, 4096  }
  0x5b   : > { %794 = vsyncadd (%p1126_p8), %s208_s9, 4294963200  ;;  %v264_v0 = vld [vmem:[%s1007_s4 + $0x80] sm:$0xff]  ;;  %v265_v1 = vld [vmem:[%s1007_s4 + $0x88] sm:$0xff]  ;;  %p238_p9 = scmp.lt.s32.totalorder %s813_s15, 2  ;;  %s595_s22 = smul.u32 24, %s1003_s8 }
  0x5c   : > { %v248_v2 = vld [vmem:[%s1007_s4] sm:$0xff]  ;;  %v547_v3 = vpack.c.bf16 %v265_v1, %v264_v0  ;;  %v249_v4 = vld [vmem:[%s1007_s4 + $0x8] sm:$0xff]  ;;  %v266_v5 = vld [vmem:[%s1007_s4 + $0x90] sm:$0xff]  ;;  %s503_s5 = sshll.u32 %s813_s15, 7  ;;  %s371_s26 = scalar_lea.sflag [#allocation4], %s1003_s8 }
  0x5d   : > { %v267_v6 = vld [vmem:[%s1007_s4 + $0x98] sm:$0xff]  ;;  %v549_v7 = vpack.c.bf16 %v249_v4, %v248_v2  ;;  %v250_v9 = vld [vmem:[%s1007_s4 + $0x10] sm:$0xff]  ;;  %v268_v11 = vld [vmem:[%s1007_s4 + $0xa0] sm:$0xff]  ;;  %s239_s20 = scalar_select %p238_p9, %s813_s15, 2 }
  0x5e   : > { %v551_v8 = vpack.c.bf16 %v267_v6, %v266_v5  ;;  %v251_v10 = vld [vmem:[%s1007_s4 + $0x18] sm:$0xff]  ;;  %579 = vmatprep.subr.bf16.mxu1 %v547_v3  ;;  %548 = vmatprep.subr.bf16.mxu0 %v547_v3  ;;  %v269_v12 = vld [vmem:[%s1007_s4 + $0xa8] sm:$0xff]  ;;  %v252_v15 = vld [vmem:[%s1007_s4 + $0x20] sm:$0xff]  ;;  %s236_s11 = scalar_lea.vmem [#allocation7], %s595_s22  ;;  %s1057_s21 = scalar_lea.hbm %s1108_s3, %s503_s5 }
  0x5f   : > { %587 = vmatpush3.bf16.msra.mxu1 %v549_v7  ;;  %550 = vmatpush3.bf16.msra.mxu0 %v549_v7  ;;  %v553_v13 = vpack.c.bf16 %v251_v10, %v250_v9  ;;  %v555_v14 = vpack.c.bf16 %v269_v12, %v268_v11  ;;  %v253_v16 = vld [vmem:[%s1007_s4 + $0x28] sm:$0xff]  ;;  %v270_v17 = vld [vmem:[%s1007_s4 + $0xb0] sm:$0xff]  ;;  %v271_v18 = vld [vmem:[%s1007_s4 + $0xb8] sm:$0xff]  ;;  %s240_s28 = scalar_lea.vmem %s1107_s2, %s239_s20  ;;  %s386_s19 = sshll.u32 %s236_s11, 4  ;;  %s1052_s19 = int_to_ptr.vmem [resolvable:$true] %s386_s19 }
  0x60   : > { %580 = vmatprep.subr.bf16.mxu1 %v551_v8  ;;  %552 = vmatprep.subr.bf16.mxu0 %v551_v8  ;;  %v557_v19 = vpack.c.bf16 %v253_v16, %v252_v15  ;;  %v559_v20 = vpack.c.bf16 %v271_v18, %v270_v17  ;;  %v254_v21 = vld [vmem:[%s1007_s4 + $0x30] sm:$0xff]  ;;  %v255_v22 = vld [vmem:[%s1007_s4 + $0x38] sm:$0xff]  ;;  %v272_v23 = vld [vmem:[%s1007_s4 + $0xc0] sm:$0xff]  ;;  %s735_s7 = scalar_lea.vmem %s1052_s19, 384  ;;  %p1127_p4 = scmp.ne.s32.totalorder %s1118_s23, 0 }
  0x61   : > { %v273_v24 = vld [vmem:[%s1007_s4 + $0xc8] sm:$0xff]  ;;  %v243_v26 = vld [vmem:[#allocation2 + $0x8] sm:$0xff]  ;;  %v561_v27 = vpack.c.bf16 %v255_v22, %v254_v21  ;;  %v256_v29 = vld [vmem:[%s1007_s4 + $0x40] sm:$0xff]  ;;  %p736_p11 = scmp.ne.s32.totalorder %s1052_s19, %s735_s7  ;;  %s830_s15 = smov [#allocation7]  }
  0x62   : > { %v245_v25 = vld [vmem:[#allocation2 + $0x18] sm:$0xff]  ;;  %v563_v28 = vpack.c.bf16 %v273_v24, %v272_v23  ;;  %v274_v31 = vld [vmem:[%s1007_s4 + $0xd0] sm:$0xff]  ;;  %v275_v32 = vld [vmem:[%s1007_s4 + $0xd8] sm:$0xff]  ;;  %351 = vmatprep.mubr.f32.mxu0 %v243_v26  ;;  %s739_s6 = sshll.u32 %s830_s15, 4  ;;  %s740_s6 = int_to_ptr.vmem [resolvable:$false] %s739_s6 }
  0x63   : > { %588 = vmatpush3.bf16.msra.mxu1 %v553_v13  ;;  %554 = vmatpush3.bf16.msra.mxu0 %v553_v13  ;;  %v257_v30 = vld [vmem:[%s1007_s4 + $0x48] sm:$0xff]  ;;  %v567_v34 = vpack.c.bf16 %v275_v32, %v274_v31  ;;  %v258_v35 = vld [vmem:[%s1007_s4 + $0x50] sm:$0xff]  ;;  %v259_v36 = vld [vmem:[%s1007_s4 + $0x58] sm:$0xff]  ;;  %p737_p13 = pnand %p736_p11, %p1127_p4  ;;  %s741_s9 = scalar_lea.vmem %s740_s6, 768 }
  0x64   : > { %581 = vmatprep.subr.bf16.mxu1 %v555_v14  ;;  %556 = vmatprep.subr.bf16.mxu0 %v555_v14  ;;  %v565_v33 = vpack.c.bf16 %v257_v30, %v256_v29  ;;  %v276_v37 = vld [vmem:[%s1007_s4 + $0xe0] sm:$0xff]  ;;  %v277_v38 = vld [vmem:[%s1007_s4 + $0xe8] sm:$0xff]  ;;  %v569_v39 = vpack.c.bf16 %v259_v36, %v258_v35  ;;  %v278_v43 = vld [vmem:[%s1007_s4 + $0xf0] sm:$0xff]  ;;  %p742_p5 = scmp.lt.s32.totalorder %s1052_s19, %s740_s6  ;;  %p743_p3 = scmp.lt.s32.totalorder %s741_s9, %s735_s7 }
  0x65   : > { %356 = vmatprep.mubr.f32.mxu1 %v245_v25  ;;  %v571_v40 = vpack.c.bf16 %v277_v38, %v276_v37  ;;  %v260_v41 = vld [vmem:[%s1007_s4 + $0x60] sm:$0xff]  ;;  %v261_v42 = vld [vmem:[%s1007_s4 + $0x68] sm:$0xff]  ;;  %v279_v44 = vld [vmem:[%s1007_s4 + $0xf8] sm:$0xff]  ;;  %p738_p0 = pneg %p737_p13 }
  0x66   : > { %v573_v45 = vpack.c.bf16 %v261_v42, %v260_v41  ;;  %v575_v46 = vpack.c.bf16 %v279_v44, %v278_v43  ;;  %v262_v47 = vld [vmem:[%s1007_s4 + $0x70] sm:$0xff]  ;;  %v263_v48 = vld [vmem:[%s1007_s4 + $0x78] sm:$0xff]  ;;  %v244_v50 = vld [vmem:[#allocation2 + $0x10] sm:$0xff]  ;;  %p744_p6 = por %p743_p3, %p742_p5 }
  0x67   : > { %589 = vmatpush3.bf16.msra.mxu1 %v557_v19  ;;  %558 = vmatpush3.bf16.msra.mxu0 %v557_v19  ;;  %v577_v49 = vpack.c.bf16 %v263_v48, %v262_v47  ;;  %v242_v51 = vld [vmem:[#allocation2] sm:$0xff]  ;;  %v247_v52 = vld [vmem:[#allocation2 + $0x28] sm:$0xff] }
  0x68   : > { %582 = vmatprep.subr.bf16.mxu1 %v559_v20  ;;  %560 = vmatprep.subr.bf16.mxu0 %v559_v20  ;;  %v246_v53 = vld [vmem:[#allocation2 + $0x20] sm:$0xff]  ;;  %p745_p12 = pnand %p744_p6, %p738_p0 }
  0x69   : > { %v502_v56 = vld [vmem:[%s240_s28] ss:$0 sm:$0xff] }
  0x6b   : > { %590 = vmatpush3.bf16.msra.mxu1 %v561_v27  ;;  %562 = vmatpush3.bf16.msra.mxu0 %v561_v27 }
  0x6c   : > { %583 = vmatprep.subr.bf16.mxu1 %v563_v28  ;;  %564 = vmatprep.subr.bf16.mxu0 %v563_v28 }
  0x6f   : > { %591 = vmatpush3.bf16.msra.mxu1 %v565_v33  ;;  %566 = vmatpush3.bf16.msra.mxu0 %v565_v33 }
  0x70   : > { %584 = vmatprep.subr.bf16.mxu1 %v567_v34  ;;  %568 = vmatprep.subr.bf16.mxu0 %v567_v34 }
  0x73   : > { %592 = vmatpush3.bf16.msra.mxu1 %v569_v39  ;;  %570 = vmatpush3.bf16.msra.mxu0 %v569_v39 }
  0x74   : > { %585 = vmatprep.subr.bf16.mxu1 %v571_v40  ;;  %572 = vmatprep.subr.bf16.mxu0 %v571_v40 }
  0x77   : > { %593 = vmatpush3.bf16.msra.mxu1 %v573_v45  ;;  %574 = vmatpush3.bf16.msra.mxu0 %v573_v45 }
  0x78   : > { %586 = vmatprep.subr.bf16.mxu1 %v575_v46  ;;  %576 = vmatprep.subr.bf16.mxu0 %v575_v46 }
  0x7b   : > { %594 = vmatpush3.bf16.msra.mxu1 %v577_v49  ;;  %578 = vmatpush3.bf16.msra.mxu0 %v577_v49 }
  0x7e   : > { %357 = vmatmul.mubr.f32.vlgmr.msra.gmra.mrb[0].mxu1 %v244_v50  ;;  %352 = vmatmul.mubr.f32.vlgmr.msra.gmra.mrb[0].mxu0 %v242_v51 }
  0x7f   : > { %361 = vmatprep.mubr.f32.mxu1 %v247_v52 }
  0x82   : > { %362 = vmatmul.mubr.f32.gmra.mrb[2].mxu1 %v246_v53 }
 0x151   : > { %v541_v54 = vpop.f32.mrb[0].mxu1  ;;  %v538_v55 = vpop.f32.mrb[0].mxu0 }
 0x152   : > { %v542_v57 = vpop.f32.mrb[1].mxu1  ;;  %v539_v58 = vpop.f32.mrb[1].mxu0 }
 0x153   : > { %v543_v59 = vadd.f32 %v542_v57, %v541_v54  ;;  %v540_v60 = vadd.f32 %v539_v58, %v538_v55 }
 0x155   : > { %v359_v61 = vadd.f32 %v543_v59, %v502_v56  ;;  %v354_v62 = vadd.f32 %v540_v60, %v502_v56  ;;  %v544_v63 = vpop.f32.mrb[2].mxu1 }
 0x156   : > { %v545_v0 = vpop.f32.mrb[3].mxu1 }
 0x157   : > { %368 = vst [vmem:[%s236_s11 + $0x8] sm:$0xff] %v359_v61  ;;  %367 = vst [vmem:[%s236_s11] sm:$0xff] %v354_v62  ;;  %v546_v1 = vadd.f32 %v545_v0, %v544_v63 }
 0x159   : > { %v364_v2 = vadd.f32 %v546_v1, %v502_v56 }
 0x15b   : > { %369 = vst [vmem:[%s236_s11 + $0x10] sm:$0xff] %v364_v2 }
 0x15c   : > { %748 = shalt.err (!%p745_p12)
}
 0x15d   : > { %s749_s4 = scalar_lea.hbm %s1057_s21, 384  ;;  %s753_s25 = scalar_lea.hbm %s1108_s3, 1152 }
 0x15e   : > { %p750_p2 = scmp.ne.s32.totalorder %s1057_s21, %s749_s4  ;;  %p754_p1 = scmp.lt.u32.totalorder %s1057_s21, %s1108_s3 }
 0x15f   : > { %p755_p8 = scmp.lt.u32.totalorder %s753_s25, %s749_s4  ;;  %p757_p11 = scmp.lt.u32.totalorder %s749_s4, %s1057_s21 }
 0x160   : > { %p751_p7 = pnand %p750_p2, %p1127_p4 }
 0x161   : > { %p756_p9 = por %p755_p8, %p754_p1 }
 0x162   : > { %p752_p10 = pneg %p751_p7 }
 0x163   : > { %p758_p13 = por %p757_p11, %p756_p9 }
 0x165   : > { %p759_p0 = pnand %p758_p13, %p752_p10 }
 0x167   : > { %762 = shalt.err (!%p759_p0)
}
 0x168   : > { %s831_s11 = smov 128   ;;  %s832_s5 = smov 384  }
 0x169   : > { %s833_s10 = smov 8  }
 0x16a   : > { %602 = dma.vmem_to_hbm [thread:$0]  (%p1127_p4), %s1052_s19, 384, %s1057_s21, %s371_s26, %s831_s11, %s832_s5, %s833_s10  }
 0x16b PF: > { %p619_p5 = scmp.ge.s32.totalorder %s821_s17, 2  ;;  %s401_s27 = sand.u32 1, %s801_s12  }
 0x16c   : > { %p1128_p3 = scmp.ne.s32.totalorder %s1119_s24, 0  ;;  %s402_s7 = scalar_lea.sflag [#allocation4], %s401_s27 }
 0x16e   : > { %p613_p6 = pnand %p619_p5, %p1128_p3 }
 0x170   : > { %796 = dma.done.wait (!%p613_p6), %s402_s7, 384  }
 0x171   : > { %798 = vsyncadd (!%p613_p6), %s402_s7, 4294966912  ;;  %s20_s17 = sadd.s32 1, %s821_s17   ;;  %s1129_s12 = smov %s805_s13 }
 0x172   : > { %p17_p12 = scmp.ge.s32.totalorder %s20_s17, 5   ;;  %s1130_s13 = smov %s809_s14 }
 0x173   : > { %s1131_s14 = smov %s964_s18  ;;  %s1132_s15 = smov %s817_s16 }
 0x174   : > { %s1133_s16 = smov %s1135_s30  ;;  %19 = sbr.rel (!%p17_p12) target bundleno = 7 (0x7), region = 86 }
 0x17b   :  { %407 = vsyncpa [#allocation3], 1 }
 0x17c   :  { %409 = vsyncpa [#allocation3 + $0x1], 1 }
 0x17d   :  { %410 = vsyncpa [#allocation6], 1 }
 0x17e   :  { %412 = vsyncpa [#allocation6 + $0x1], 1 }
 0x17f   :  { %413 = vsyncpa [#allocation4], 1 }
 0x180   :  { %415 = vsyncpa [#allocation4 + $0x1], 1 }

</bundles_post_ra>
